<compile_context>
chip_gen: v6e
topology: v6e:2x2x1
jax: 0.10.0
libtpu: 0.0.40
codegen_flags: <defaults>
</compile_context>

<pallas_src>
import math
from functools import partial

import jax
import jax.numpy as jnp
from jax.experimental import pallas as pl
from jax.experimental.pallas import tpu as pltpu


# ----------------------------------------------------------------------------
# Config (consistent with the module's __init__)
# ----------------------------------------------------------------------------
CONFIG = dict(
    channels=32,
    multipatch_num=2,
    L_patch_len=2,
    num_steps=50,
    diffusion_embedding_dim=32,
    side_dim=8,
    attr_dim=8,
    nheads=4,
    layers=2,
    is_linear=False,
    n_var=1,
)
INPUTDIM = 2
FFN_DIM = 64  # dim_feedforward of nn.TransformerEncoderLayer


# ----------------------------------------------------------------------------
# In-kernel math helpers
# ----------------------------------------------------------------------------
def _erf(x):
    # Abramowitz & Stegun 7.1.26 (f32, |err| <= 1.5e-7) — keeps torch's exact
    # GELU semantics without relying on an erf lowering inside Mosaic.
    a1, a2, a3, a4, a5 = 0.254829592, -0.284496736, 1.421413741, -1.453152027, 1.061405429
    p = 0.3275911
    ax = jnp.abs(x)
    t = 1.0 / (1.0 + p * ax)
    poly = ((((a5 * t + a4) * t + a3) * t + a2) * t + a1) * t
    y = 1.0 - poly * jnp.exp(-ax * ax)
    return jnp.where(x >= 0.0, y, -y)


def _gelu_exact(x):
    return 0.5 * x * (1.0 + _erf(x * 0.7071067811865476))


def _layernorm(x, g, b, eps=1e-5):
    mu = jnp.mean(x, axis=-1, keepdims=True)
    var = jnp.mean((x - mu) * (x - mu), axis=-1, keepdims=True)
    return (x - mu) * jax.lax.rsqrt(var + eps) * g + b


# ----------------------------------------------------------------------------
# Kernel 1: diffusion embedding + ALL layers' diffusion projections (hoisted)
# ----------------------------------------------------------------------------
def _diffusion_kernel(emb_ref, w1_ref, b1_ref, w2_ref, b2_ref, wd_ref, bd_ref, o_ref):
    f32 = jnp.float32
    x = jnp.dot(emb_ref[...], w1_ref[...], preferred_element_type=f32) + b1_ref[...]
    x = x * jax.nn.sigmoid(x)                                            # SiLU
    x = jnp.dot(x, w2_ref[...], preferred_element_type=f32) + b2_ref[...]
    x = x * jax.nn.sigmoid(x)                                            # SiLU
    y = jnp.dot(x, wd_ref[...], preferred_element_type=f32) + bd_ref[...]
    o_ref[...] = y.astype(o_ref.dtype)


def diffusion_dproj_pallas(emb, w1, b1, w2, b2, wd_all, bd_all):
    B = emb.shape[0]
    LC = wd_all.shape[1]
    return pl.pallas_call(
        _diffusion_kernel,
        out_shape=jax.ShapeDtypeStruct((B, LC), jnp.float32),
    )(emb, w1, b1, w2, b2, wd_all, bd_all)


# ----------------------------------------------------------------------------
# Kernel 2: fused per-patch network (embeddings + residual stack + decode tail)
# ----------------------------------------------------------------------------
def _fused_patch_kernel(x_tok_ref, side_tok_ref, dproj_ref,
                        tsw_ref, tsb_ref, cw_ref, cb_ref,
                        wqkv_ref, bqkv_ref, wo_ref, bo_ref,
                        ln1g_ref, ln1b_ref, w1_ref, b1_ref,
                        w2_ref, b2_ref, ln2g_ref, ln2b_ref,
                        msw_ref, msb_ref, outw_ref, outb_ref,
                        op1w_ref, op1b_ref, decw_ref, decb_ref,
                        o_ref, *, nheads, layers, use_transformer):
    f32 = jnp.float32

    x_tok = x_tok_ref[0]          # (Nl, Pl*K*inputdim)
    side_tok = side_tok_ref[0]    # (Nl, Pl*K*side_dim)
    dproj = dproj_ref[0]          # (layers, C)

    # --- patch embeddings (TsPatchEmbedding: Linear+ReLU, CondPatchEmbedding: Linear)
    x_state = jnp.maximum(
        jnp.dot(x_tok, tsw_ref[...], preferred_element_type=f32) + tsb_ref[...], 0.0)
    side_state = jnp.dot(side_tok, cw_ref[...], preferred_element_type=f32) + cb_ref[...]

    Nl, C = x_state.shape
    dh = C // nheads
    scale = 1.0 / math.sqrt(dh)

    skip_acc = jnp.zeros((Nl, C), f32)

    for l in range(layers):  # static unroll over residual layers (weights differ per layer)
        y = x_state + dproj[l:l + 1, :]                                  # (Nl, C)

        if use_transformer:  # forward_time; skipped when Nl == 1 (reference early-returns)
            qkv = jnp.dot(y, wqkv_ref[l], preferred_element_type=f32) + bqkv_ref[l]
            q, k, v = qkv[:, :C], qkv[:, C:2 * C], qkv[:, 2 * C:]
            wo = wo_ref[l]                                               # (C, C)
            attn = jnp.zeros((Nl, C), f32)
            for h in range(nheads):                                      # nheads is small
                sl = slice(h * dh, (h + 1) * dh)
                qh, kh, vh = q[:, sl], k[:, sl], v[:, sl]
                s = jnp.dot(qh, kh.T, preferred_element_type=f32) * scale
                s = s - jnp.max(s, axis=-1, keepdims=True)
                p = jnp.exp(s)
                p = p * pl.reciprocal(jnp.sum(p, axis=-1, keepdims=True), approx=True)
                hv = jnp.dot(p, vh, preferred_element_type=f32)          # (Nl, dh)
                attn = attn + jnp.dot(hv, wo[sl, :], preferred_element_type=f32)
            attn = attn + bo_ref[l]
            h1 = _layernorm(y + attn, ln1g_ref[l], ln1b_ref[l])
            ff = _gelu_exact(jnp.dot(h1, w1_ref[l], preferred_element_type=f32) + b1_ref[l])
            ff = jnp.dot(ff, w2_ref[l], preferred_element_type=f32) + b2_ref[l]
            y = _layernorm(h1 + ff, ln2g_ref[l], ln2b_ref[l])
        # forward_feature: identity (Nk == 1 after patch embedding)

        # --- gated residual core: mid/side projections fused into one matmul
        ys = jnp.concatenate([y, side_state], axis=-1)                   # (Nl, C+Sd)
        z = jnp.dot(ys, msw_ref[l], preferred_element_type=f32) + msb_ref[l]   # (Nl, 2C)
        g = jax.nn.sigmoid(z[:, :C]) * jnp.tanh(z[:, C:])
        o = jnp.dot(g, outw_ref[l], preferred_element_type=f32) + outb_ref[l]  # (Nl, 2C)
        x_state = (x_state + o[:, :C]) * (1.0 / math.sqrt(2.0))
        skip_acc = skip_acc + o[:, C:]

    # --- tail: skip normalization + output_projection1 (+ReLU) + patch decoder
    h = skip_acc * (1.0 / math.sqrt(layers))
    h = jnp.maximum(jnp.dot(h, op1w_ref[...], preferred_element_type=f32) + op1b_ref[...], 0.0)
    dec = jnp.dot(h, decw_ref[...], preferred_element_type=f32) + decb_ref[...]  # (Nl, Pl*n_var)
    o_ref[0] = dec.astype(o_ref.dtype)


def _weight_spec(a):
    # Full-array block, constant index map (resident across the batch grid).
    return pl.BlockSpec(a.shape, lambda b, _n=a.ndim: (0,) * _n)


def fused_patch_forward(x_tok, side_tok, dproj_all, pw, *, use_transformer, nheads, layers):
    B, Nl, Pin = x_tok.shape
    Psd = side_tok.shape[-1]
    C = pw['op1w'].shape[0]
    Pdec = pw['decw'].shape[1]

    weights = [pw['tsw'], pw['tsb'], pw['cw'], pw['cb'],
               pw['wqkv'], pw['bqkv'], pw['wo'], pw['bo'],
               pw['ln1g'], pw['ln1b'], pw['w1'], pw['b1'],
               pw['w2'], pw['b2'], pw['ln2g'], pw['ln2b'],
               pw['msw'], pw['msb'], pw['outw'], pw['outb'],
               pw['op1w'], pw['op1b'], pw['decw'], pw['decb']]

    in_specs = [pl.BlockSpec((1, Nl, Pin), lambda b: (b, 0, 0)),
                pl.BlockSpec((1, Nl, Psd), lambda b: (b, 0, 0)),
                pl.BlockSpec((1, layers, C), lambda b: (b, 0, 0))]
    in_specs += [_weight_spec(w) for w in weights]

    return pl.pallas_call(
        partial(_fused_patch_kernel, nheads=nheads, layers=layers,
                use_transformer=use_transformer),
        grid=(B,),
        in_specs=in_specs,
        out_specs=pl.BlockSpec((1, Nl, Pdec), lambda b: (b, 0, 0)),
        out_shape=jax.ShapeDtypeStruct((B, Nl, Pdec), jnp.float32),
        compiler_params=pltpu.CompilerParams(dimension_semantics=("parallel",)),
    )(x_tok, side_tok, dproj_all, *weights)


# ----------------------------------------------------------------------------
# Kernel 3: multipatch mixer (Linear(multipatch_num, 1) as elementwise mix)
# ----------------------------------------------------------------------------
def _mixer_kernel(x_ref, w_ref, b_ref, o_ref, *, m):
    acc = x_ref[0] * w_ref[0]
    for j in range(1, m):
        acc = acc + x_ref[j] * w_ref[j]
    o_ref[...] = (acc + b_ref[0]).astype(o_ref.dtype)


def mixer_pallas(stacked, w, b):
    # stacked: (M, R, L); w: (M,), b: (1,) in SMEM -> out (R, L)
    M, R, L = stacked.shape
    return pl.pallas_call(
        partial(_mixer_kernel, m=M),
        in_specs=[pl.BlockSpec(memory_space=pltpu.MemorySpace.VMEM),
                  pl.BlockSpec(memory_space=pltpu.MemorySpace.SMEM),
                  pl.BlockSpec(memory_space=pltpu.MemorySpace.SMEM)],
        out_specs=pl.BlockSpec(memory_space=pltpu.MemorySpace.VMEM),
        out_shape=jax.ShapeDtypeStruct((R, L), jnp.float32),
    )(stacked, w, b)


# ----------------------------------------------------------------------------
# Glue: patchify (ReplicationPad2d + unfold + permute/reshape) — layout only
# ----------------------------------------------------------------------------
def _patchify(x, Pl):
    # x: (B, C, K, L) NCHW-like -> tokens (B, Nl, Pl*K*C); torch feature
    # ordering: flat index = p*K*C + k*C + c (c fastest).
    B, C, K, L = x.shape
    if L % Pl:
        Nl = L // Pl + 1
        x = jnp.pad(x, ((0, 0), (0, 0), (0, 0), (0, Nl * Pl - L)), mode='edge')
    else:
        Nl = L // Pl
    x = x.reshape(B, C, K, Nl, Pl)
    x = jnp.transpose(x, (0, 3, 4, 2, 1))          # (B, Nl, Pl, K, C)
    return x.reshape(B, Nl, Pl * K * C)


def _build_diffusion_table(num_steps, embedding_dim):
    half = embedding_dim // 2
    steps = jnp.arange(num_steps, dtype=jnp.float32)[:, None]
    freqs = (10.0 ** (jnp.arange(half, dtype=jnp.float32) / (half - 1) * 4.0))[None, :]
    table = steps * freqs
    return jnp.concatenate([jnp.sin(table), jnp.cos(table)], axis=1)  # (steps, E)


# ----------------------------------------------------------------------------
# Deterministic synthetic parameter init (shapes follow the PyTorch __init__)
# ----------------------------------------------------------------------------
def init_params(key, cfg, inputdim=2):
    C, E, Sd = cfg['channels'], cfg['diffusion_embedding_dim'], cfg['side_dim']
    keys = iter(jax.random.split(key, 512))

    def lin(fan_in, fan_out):
        w = jax.random.normal(next(keys), (fan_in, fan_out), jnp.float32) / math.sqrt(fan_in)
        b = jax.random.normal(next(keys), (1, fan_out), jnp.float32) * 0.01
        return w, b

    p = {'config': cfg}
    p['diff_table'] = _build_diffusion_table(cfg['num_steps'], E)
    p['diff_proj1_w'], p['diff_proj1_b'] = lin(E, E)
    p['diff_proj2_w'], p['diff_proj2_b'] = lin(E, E)
    p['outproj1_w'], p['outproj1_b'] = lin(C, C)

    p['ts_emb'], p['side_emb'], p['dec'] = [], [], []
    for i in range(cfg['multipatch_num']):
        Pl = cfg['L_patch_len'] ** i
        w, b = lin(Pl * inputdim, C)          # TsPatchEmbedding Linear (K == 1)
        p['ts_emb'].append({'w': w, 'b': b})
        w, b = lin(Pl * Sd, Sd)               # CondPatchEmbedding Linear
        p['side_emb'].append({'w': w, 'b': b})
        w, b = lin(C, Pl * cfg['n_var'] * 1)  # PatchDecoder Linear (channels=1)
        p['dec'].append({'w': w, 'b': b})

    p['res_layers'] = []
    for _ in range(cfg['layers']):
        lp = {}
        lp['diff_w'], lp['diff_b'] = lin(E, C)
        lp['side_w'], lp['side_b'] = lin(Sd, 2 * C)
        lp['mid_w'], lp['mid_b'] = lin(C, 2 * C)
        lp['out_w'], lp['out_b'] = lin(C, 2 * C)
        tr = {}
        tr['wq'], tr['bq'] = lin(C, C)
        tr['wk'], tr['bk'] = lin(C, C)
        tr['wv'], tr['bv'] = lin(C, C)
        tr['wo'], tr['bo'] = lin(C, C)
        tr['w1'], tr['b1'] = lin(C, FFN_DIM)
        tr['w2'], tr['b2'] = lin(FFN_DIM, C)
        tr['ln1g'] = jnp.ones((1, C), jnp.float32); tr['ln1b'] = jnp.zeros((1, C), jnp.float32)
        tr['ln2g'] = jnp.ones((1, C), jnp.float32); tr['ln2b'] = jnp.zeros((1, C), jnp.float32)
        lp['time'] = tr
        # TODO(synk): feature_layer params omitted — forward_feature is identity (Nk == 1 here).
        p['res_layers'].append(lp)

    p['mixer_w'] = jax.random.normal(next(keys), (cfg['multipatch_num'],), jnp.float32) * 0.5
    p['mixer_b'] = jnp.zeros((1,), jnp.float32)
    return p


# ----------------------------------------------------------------------------
# Pack / pre-stack weights for the fused kernels (done once, outside kernels)
# ----------------------------------------------------------------------------
def pack_params(p):
    cfg = p['config']

    packed = {'config': cfg,
              'diff_table': p['diff_table'],
              'diff_proj1_w': p['diff_proj1_w'], 'diff_proj1_b': p['diff_proj1_b'],
              'diff_proj2_w': p['diff_proj2_w'], 'diff_proj2_b': p['diff_proj2_b'],
              'mixer_w': p['mixer_w'], 'mixer_b': p['mixer_b']}

    # All layers' diffusion projections in one (E, layers*C) weight.
    packed['diff_w_all'] = jnp.concatenate([lp['diff_w'] for lp in p['res_layers']], axis=1)
    packed['diff_b_all'] = jnp.concatenate([lp['diff_b'] for lp in p['res_layers']], axis=1)

    def stack(fn):
        return jnp.stack([fn(lp) for lp in p['res_layers']], axis=0)

    shared = {
        'wqkv': stack(lambda lp: jnp.concatenate(
            [lp['time']['wq'], lp['time']['wk'], lp['time']['wv']], axis=1)),  # (lay, C, 3C)
        'bqkv': stack(lambda lp: jnp.concatenate(
            [lp['time']['bq'], lp['time']['bk'], lp['time']['bv']], axis=1)),  # (lay, 1, 3C)
        'wo': stack(lambda lp: lp['time']['wo']),
        'bo': stack(lambda lp: lp['time']['bo']),
        'ln1g': stack(lambda lp: lp['time']['ln1g']),
        'ln1b': stack(lambda lp: lp['time']['ln1b']),
        'w1': stack(lambda lp: lp['time']['w1']),
        'b1': stack(lambda lp: lp['time']['b1']),
        'w2': stack(lambda lp: lp['time']['w2']),
        'b2': stack(lambda lp: lp['time']['b2']),
        'ln2g': stack(lambda lp: lp['time']['ln2g']),
        'ln2b': stack(lambda lp: lp['time']['ln2b']),
        # mid + side projections fused: [y | side] @ (C+Sd, 2C)
        'msw': stack(lambda lp: jnp.concatenate([lp['mid_w'], lp['side_w']], axis=0)),
        'msb': stack(lambda lp: lp['mid_b'] + lp['side_b']),
        'outw': stack(lambda lp: lp['out_w']),
        'outb': stack(lambda lp: lp['out_b']),
        'op1w': p['outproj1_w'], 'op1b': p['outproj1_b'],
    }

    packed['patch'] = []
    for i in range(cfg['multipatch_num']):
        pw = dict(shared)
        pw['tsw'], pw['tsb'] = p['ts_emb'][i]['w'], p['ts_emb'][i]['b']
        pw['cw'], pw['cb'] = p['side_emb'][i]['w'], p['side_emb'][i]['b']
        pw['decw'], pw['decb'] = p['dec'][i]['w'], p['dec'][i]['b']
        packed['patch'].append(pw)
    return packed


# ----------------------------------------------------------------------------
# Full forward (Diff_CSDI_MultiPatch.forward)
# ----------------------------------------------------------------------------
def diff_csdi_multipatch_forward(packed, x_raw, side_emb_raw, attr_emb_raw, diffusion_step):
    del attr_emb_raw  # unused in the PyTorch forward (is_attr_proj=False, never read)
    cfg = packed['config']
    B, Cin, K, L = x_raw.shape
    C = cfg['channels']
    layers = cfg['layers']
    n_var = cfg['n_var']

    # Diffusion embedding + all layers' diffusion projections (one launch, hoisted).
    emb = jnp.take(packed['diff_table'], diffusion_step, axis=0)          # (B, E)
    dproj_flat = diffusion_dproj_pallas(
        emb, packed['diff_proj1_w'], packed['diff_proj1_b'],
        packed['diff_proj2_w'], packed['diff_proj2_b'],
        packed['diff_w_all'], packed['diff_b_all'])                       # (B, layers*C)
    dproj_all = dproj_flat.reshape(B, layers, C)

    outs = []
    for i in range(cfg['multipatch_num']):
        Pl = cfg['L_patch_len'] ** i
        x_tok = _patchify(x_raw, Pl)                                      # (B, Nl, Pl*K*Cin)
        side_tok = _patchify(side_emb_raw, Pl)                            # (B, Nl, Pl*K*Sd)
        Nl = x_tok.shape[1]

        dec = fused_patch_forward(
            x_tok, side_tok, dproj_all, packed['patch'][i],
            use_transformer=(Nl > 1), nheads=cfg['nheads'], layers=layers)  # (B, Nl, Pl*n_var)

        dec = dec.reshape(B, Nl, Pl, n_var)
        dec = jnp.transpose(dec, (0, 3, 1, 2)).reshape(B, n_var, Nl * Pl)[:, :, :L]  # (B, K, L)
        outs.append(dec)

    stacked = jnp.stack(outs, axis=0).reshape(cfg['multipatch_num'], B * K, L)
    mixed = mixer_pallas(stacked, packed['mixer_w'], packed['mixer_b'])   # (B*K, L)
    return mixed.reshape(B, K, L)


# ----------------------------------------------------------------------------
if __name__ == "__main__":
    key = jax.random.PRNGKey(0)
    kp, kx, ks, ka, kd = jax.random.split(key, 5)

    params = init_params(kp, CONFIG, inputdim=INPUTDIM)
    packed = pack_params(params)

    B, K, L = 2, 1, 16   # module's Linear shapes require K == n_var == 1
    x_raw = jax.random.normal(kx, (B, INPUTDIM, K, L), jnp.float32)
    side_emb_raw = jax.random.normal(ks, (B, CONFIG['side_dim'], K, L), jnp.float32)
    attr_emb_raw = jax.random.normal(ka, (B, CONFIG['attr_dim']), jnp.float32)  # unused
    diffusion_step = jax.random.randint(kd, (B,), 0, CONFIG['num_steps'], dtype=jnp.int32)

    out = diff_csdi_multipatch_forward(packed, x_raw, side_emb_raw, attr_emb_raw, diffusion_step)
    out = jax.block_until_ready(out)
    assert out.shape == (B, K, L), out.shape
    assert bool(jnp.all(jnp.isfinite(out)))
    print("KERNEL_OK")
</pallas_src>

<mosaic_0001>
module attributes {stable_mosaic.version = 11 : i64} {
  func.func @_diffusion_kernel(%arg0: memref<2x32xf32, #tpu.memory_space<vmem>>, %arg1: memref<32x32xf32, #tpu.memory_space<vmem>>, %arg2: memref<1x32xf32, #tpu.memory_space<vmem>>, %arg3: memref<32x32xf32, #tpu.memory_space<vmem>>, %arg4: memref<1x32xf32, #tpu.memory_space<vmem>>, %arg5: memref<32x64xf32, #tpu.memory_space<vmem>>, %arg6: memref<1x64xf32, #tpu.memory_space<vmem>>, %arg7: memref<2x64xf32, #tpu.memory_space<vmem>>) attributes {dimension_semantics = [], scalar_prefetch = 0 : i64, scratch_operands = 0 : i64, tpu.core_type = #tpu.core_type<tc>} {
    %c0 = arith.constant 0 : index
    %c0_0 = arith.constant 0 : index
    %0 = vector.load %arg0[%c0, %c0_0] : memref<2x32xf32, #tpu.memory_space<vmem>>, vector<2x32xf32>
    %c0_1 = arith.constant 0 : index
    %c0_2 = arith.constant 0 : index
    %1 = vector.load %arg1[%c0_1, %c0_2] : memref<32x32xf32, #tpu.memory_space<vmem>>, vector<32x32xf32>
    %cst = arith.constant dense<0.000000e+00> : vector<2x32xf32>
    %2 = tpu.matmul %0, %1, %cst {dimension_numbers = #tpu.dot_dimension_numbers<[1], [0], [0], [1], [0, 0, 1, 1], [], []>} : vector<2x32xf32>, vector<32x32xf32>, vector<2x32xf32> -> vector<2x32xf32>
    %c0_3 = arith.constant 0 : index
    %c0_4 = arith.constant 0 : index
    %3 = vector.load %arg2[%c0_3, %c0_4] : memref<1x32xf32, #tpu.memory_space<vmem>>, vector<1x32xf32>
    %4 = vector.broadcast %3 : vector<1x32xf32> to vector<2x32xf32>
    %5 = arith.addf %2, %4 : vector<2x32xf32>
    %6 = arith.negf %5 : vector<2x32xf32>
    %7 = math.exp %6 : vector<2x32xf32>
    %cst_5 = arith.constant 1.000000e+00 : f32
    %8 = vector.broadcast %cst_5 : f32 to vector<2x32xf32>
    %9 = arith.addf %8, %7 : vector<2x32xf32>
    %10 = arith.divf %8, %9 : vector<2x32xf32>
    %11 = arith.mulf %5, %10 : vector<2x32xf32>
    %c0_6 = arith.constant 0 : index
    %c0_7 = arith.constant 0 : index
    %12 = vector.load %arg3[%c0_6, %c0_7] : memref<32x32xf32, #tpu.memory_space<vmem>>, vector<32x32xf32>
    %cst_8 = arith.constant dense<0.000000e+00> : vector<2x32xf32>
    %13 = tpu.matmul %11, %12, %cst_8 {dimension_numbers = #tpu.dot_dimension_numbers<[1], [0], [0], [1], [0, 0, 1, 1], [], []>} : vector<2x32xf32>, vector<32x32xf32>, vector<2x32xf32> -> vector<2x32xf32>
    %c0_9 = arith.constant 0 : index
    %c0_10 = arith.constant 0 : index
    %14 = vector.load %arg4[%c0_9, %c0_10] : memref<1x32xf32, #tpu.memory_space<vmem>>, vector<1x32xf32>
    %15 = vector.broadcast %14 : vector<1x32xf32> to vector<2x32xf32>
    %16 = arith.addf %13, %15 : vector<2x32xf32>
    %17 = arith.negf %16 : vector<2x32xf32>
    %18 = math.exp %17 : vector<2x32xf32>
    %cst_11 = arith.constant 1.000000e+00 : f32
    %19 = vector.broadcast %cst_11 : f32 to vector<2x32xf32>
    %20 = arith.addf %19, %18 : vector<2x32xf32>
    %21 = arith.divf %19, %20 : vector<2x32xf32>
    %22 = arith.mulf %16, %21 : vector<2x32xf32>
    %c0_12 = arith.constant 0 : index
    %c0_13 = arith.constant 0 : index
    %23 = vector.load %arg5[%c0_12, %c0_13] : memref<32x64xf32, #tpu.memory_space<vmem>>, vector<32x64xf32>
    %cst_14 = arith.constant dense<0.000000e+00> : vector<2x64xf32>
    %24 = tpu.matmul %22, %23, %cst_14 {dimension_numbers = #tpu.dot_dimension_numbers<[1], [0], [0], [1], [0, 0, 1, 1], [], []>} : vector<2x32xf32>, vector<32x64xf32>, vector<2x64xf32> -> vector<2x64xf32>
    %c0_15 = arith.constant 0 : index
    %c0_16 = arith.constant 0 : index
    %25 = vector.load %arg6[%c0_15, %c0_16] : memref<1x64xf32, #tpu.memory_space<vmem>>, vector<1x64xf32>
    %26 = vector.broadcast %25 : vector<1x64xf32> to vector<2x64xf32>
    %27 = arith.addf %24, %26 : vector<2x64xf32>
    %c0_17 = arith.constant 0 : index
    %c0_18 = arith.constant 0 : index
    %28 = vector.load %arg7[%c0_17, %c0_18] : memref<2x64xf32, #tpu.memory_space<vmem>>, vector<2x64xf32>
    tpu.vector_store %arg7[%c0_17, %c0_18], %27 {strides = array<i32>} : memref<2x64xf32, #tpu.memory_space<vmem>>, vector<2x64xf32>,
    return
  }
}

</mosaic_0001>

<bundles_post_ra>
// kernel: tpu_custom_call.1
= control target key start
LH: loop header
LB: loop body
LE: loop exit
PB: predicated region body
PF: predicated region fallthrough
CT: control target
= control target key end

     0   :  { %12 = vsyncpa [#allocation3], 0  ;;  %s636_s0 = inlined_call_operand.hbm [shape: f32[2,32], index: 0, kind: input, shape index: {}]   ;;  %s637_s1 = inlined_call_operand.hbm [shape: f32[32,32], index: 1, kind: input, shape index: {}]   ;;  %s638_s2 = inlined_call_operand.vmem [shape: f32[1,32], index: 2, kind: input, shape index: {}]   ;;  %s639_s3 = inlined_call_operand.hbm [shape: f32[32,32], index: 3, kind: input, shape index: {}]   ;;  %s640_s4 = inlined_call_operand.vmem [shape: f32[1,32], index: 4, kind: input, shape index: {}]   ;;  %s641_s5 = inlined_call_operand.hbm [shape: f32[32,64], index: 5, kind: input, shape index: {}]   ;;  %s642_s6 = inlined_call_operand.vmem [shape: f32[1,64], index: 6, kind: input, shape index: {}]   ;;  %s643_s7 = inlined_call_operand.hbm [shape: f32[2,64], index: 7, kind: output, shape index: {}]  }
   0x1   :  { %13 = vsyncpa [#allocation6], 0 }
   0x2   :  { %14 = vsyncpa [#allocation9], 0 }
   0x3   :  { %15 = vsyncpa [#allocation4], 0  ;;  %s548_s24 = smov [#allocation5]  }
   0x4   :  { %s31_s25 = sshll.u32 %s548_s24, 4  ;;  %s32_s25 = int_to_ptr.vmem [resolvable:$true] %s31_s25 }
   0x5   :  { %s448_s26 = scalar_lea.vmem %s32_s25, 512  ;;  %p453_p1 = scmp.lt.s32.totalorder %s32_s25, %s32_s25 }
   0x6   :  { %p449_p0 = scmp.ne.s32.totalorder %s32_s25, %s448_s26  ;;  %p454_p2 = scmp.lt.s32.totalorder %s448_s26, %s448_s26 }
   0x8   :  { %p455_p3 = por %p454_p2, %p453_p1 }
   0xa   :  { %p456_p4 = pnand %p455_p3, %p449_p0 }
   0xc   :  { %459 = shalt.err (!%p456_p4)
}
   0xd   :  { %s549_s27 = smov 128   ;;  %s550_s28 = smov 8  }
   0xe   :  { %37 = dma.hbm_to_vmem [thread:$0]  %s637_s1, 512, %s32_s25, [#allocation6], %s549_s27, %s549_s27, %s550_s28  }
   0xf   :  { %s551_s8 = smov [#allocation2]   ;;  %s552_s10 = smov [#allocation7]  }
  0x10   :  { %s22_s9 = sshll.u32 %s551_s8, 4  ;;  %s45_s11 = sshll.u32 %s552_s10, 4  ;;  %s23_s9 = int_to_ptr.vmem [resolvable:$true] %s22_s9  ;;  %s46_s11 = int_to_ptr.vmem [resolvable:$true] %s45_s11 }
  0x11   :  { %s468_s12 = scalar_lea.vmem %s23_s9, 32  ;;  %p473_p6 = scmp.lt.s32.totalorder %s23_s9, %s23_s9 }
  0x12   :  { %p469_p5 = scmp.ne.s32.totalorder %s23_s9, %s468_s12  ;;  %p474_p7 = scmp.lt.s32.totalorder %s468_s12, %s468_s12 }
  0x14   :  { %p475_p8 = por %p474_p7, %p473_p6 }
  0x16   :  { %p476_p9 = pnand %p475_p8, %p469_p5 }
  0x18   :  { %479 = shalt.err (!%p476_p9)
}
  0x19   :  { %25 = dma.hbm_to_vmem [thread:$0]  %s636_s0, 32, %s23_s9, [#allocation3]  }
  0x1a   :  { %s488_s15 = scalar_lea.vmem %s46_s11, 512  ;;  %p493_p11 = scmp.lt.s32.totalorder %s46_s11, %s46_s11 }
  0x1b   :  { %p489_p10 = scmp.ne.s32.totalorder %s46_s11, %s488_s15  ;;  %p494_p12 = scmp.lt.s32.totalorder %s488_s15, %s488_s15 }
  0x1d   :  { %p495_p13 = por %p494_p12, %p493_p11 }
  0x1f   :  { %p496_p0 = pnand %p495_p13, %p489_p10 }
  0x21   :  { %499 = shalt.err (!%p496_p0)
}
  0x22   :  { %51 = dma.hbm_to_vmem [thread:$0]  %s639_s3, 512, %s46_s11, [#allocation6], %s549_s27, %s549_s27, %s550_s28  }
  0x23   :  { %s553_s17 = smov [#allocation8]  }
  0x24   :  { %s59_s18 = sshll.u32 %s553_s17, 4  ;;  %s60_s18 = int_to_ptr.vmem [resolvable:$true] %s59_s18 }
  0x25   :  { %s508_s19 = scalar_lea.vmem %s60_s18, 512  ;;  %p513_p2 = scmp.lt.s32.totalorder %s60_s18, %s60_s18 }
  0x26   :  { %p509_p1 = scmp.ne.s32.totalorder %s60_s18, %s508_s19  ;;  %p514_p3 = scmp.lt.s32.totalorder %s508_s19, %s508_s19 }
  0x28   :  { %p515_p4 = por %p514_p3, %p513_p2 }
  0x2a   :  { %p516_p5 = pnand %p515_p4, %p509_p1 }
  0x2c   :  { %519 = shalt.err (!%p516_p5)
}
  0x2d   :  { %65 = dma.hbm_to_vmem [thread:$0]  %s641_s5, 512, %s60_s18, [#allocation9], %s549_s27, %s549_s27, %s550_s28  }
  0x2e   :  { %540 = dma.done.wait [#allocation3], 32  }
  0x2f   :  { %541 = vsyncadd [#allocation3], 4294967264 }
  0x30   :  { %542 = dma.done.wait [#allocation6], 1024  }
  0x31   :  { %543 = vsyncadd [#allocation6], 4294966272 }
  0x32   :  { %544 = dma.done.wait [#allocation9], 512  }
  0x33   :  { %545 = vsyncadd [#allocation9], 4294966784  ;;  %v554_v0 = vmov 0.0   ;;  %vm555_vm0 = vmmov 0   ;;  %v84_v1 = vld [vmem:[#allocation5 + $0x18] sm:$0xff]  ;;  %v83_v2 = vld [vmem:[#allocation5 + $0x10] sm:$0xff] }
  0x34   :  { %390 = vmatprep.subr.mxu0 %v554_v0  ;;  %398 = vmatprep.mubr.msk.f32.mxu0 %vm555_vm0, %v554_v0  ;;  %v82_v3 = vld [vmem:[#allocation5 + $0x8] sm:$0xff]  ;;  %v81_v4 = vld [vmem:[#allocation5] sm:$0xff]  ;;  %v80_v5 = vld [vmem:[#allocation2] sm:$0x3]  ;;  %vm92_vm1 = vcmask 261120   ;;  %s556_s24 = smov [#allocation10]  }
  0x35   :  { %401 = vmatprep.subr.mxu1 %v554_v0  ;;  %409 = vmatprep.mubr.msk.f32.mxu1 %vm555_vm0, %v554_v0  ;;  %v176_v6 = vld [vmem:[#allocation7 + $0x18] sm:$0xff]  ;;  %v175_v7 = vld [vmem:[#allocation7 + $0x10] sm:$0xff]  ;;  %v174_v8 = vld [vmem:[#allocation7 + $0x8] sm:$0xff]  ;;  %s356_s25 = sshll.u32 %s556_s24, 4  ;;  %vm348_vm2 = vcmask 517120   ;;  %s357_s25 = int_to_ptr.vmem [resolvable:$true] %s356_s25 }
  0x36   :  { %391 = vmatpush3.msra.mxu0 %v84_v1  ;;  %402 = vmatpush3.msra.mxu1 %v176_v6  ;;  %v173_v9 = vld [vmem:[#allocation7] sm:$0xff]  ;;  %v367_v10 = vld [vmem:[%s638_s2] ss:$0 sm:$0xff]  ;;  %v266_v20 = vld [vmem:[#allocation8 + $0x10] sm:$0xff]  ;;  %p525_p7 = scmp.lt.s32.totalorder %s357_s25, %s357_s25 }
  0x37   :  { %392 = vmatprep.subr.mxu0 %v554_v0  ;;  %403 = vmatprep.subr.mxu1 %v554_v0  ;;  %v267_v19 = vld [vmem:[#allocation8 + $0x18] sm:$0xff]  ;;  %v265_v21 = vld [vmem:[#allocation8 + $0x8] sm:$0xff]  ;;  %v264_v22 = vld [vmem:[#allocation8] sm:$0xff] }
  0x38   :  { %393 = vmatpush3.msra.mxu0 %v83_v2  ;;  %404 = vmatpush3.msra.mxu1 %v175_v7  ;;  %v370_v23 = vld [vmem:[%s640_s4] ss:$0 sm:$0xff]  ;;  %s520_s4 = scalar_lea.vmem %s357_s25, 32 }
  0x39   :  { %394 = vmatprep.subr.mxu0 %v554_v0  ;;  %405 = vmatprep.subr.mxu1 %v554_v0  ;;  %v373_v32 = vld [vmem:[%s642_s6] ss:$0 sm:$0xff]  ;;  %p521_p6 = scmp.ne.s32.totalorder %s357_s25, %s520_s4  ;;  %p526_p8 = scmp.lt.s32.totalorder %s520_s4, %s520_s4 }
  0x3a   :  { %395 = vmatpush3.msra.mxu0 %v82_v3  ;;  %406 = vmatpush3.msra.mxu1 %v174_v8 }
  0x3b   :  { %396 = vmatprep.subr.mxu0 %v554_v0  ;;  %407 = vmatprep.subr.mxu1 %v554_v0  ;;  %p527_p9 = por %p526_p8, %p525_p7 }
  0x3c   :  { %397 = vmatpush3.msra.mxu0 %v81_v4  ;;  %408 = vmatpush3.msra.mxu1 %v173_v9 }
  0x3d   :  { %399 = vmatmul.mubr.msk.f32.vlgmr.msra.gmra.mxu0 %vm92_vm1, %v80_v5  ;;  %412 = vmatprep.subr.mxu0 %v554_v0  ;;  %p528_p10 = pnand %p527_p9, %p521_p6 }
  0x3e   :  { %420 = vmatprep.mubr.msk.f32.mxu0 %vm555_vm0, %v554_v0  ;;  %413 = vmatpush3.msra.mxu0 %v267_v19 }
  0x3f   :  { %414 = vmatprep.subr.mxu0 %v554_v0 }
  0x40   :  { %415 = vmatpush3.msra.mxu0 %v266_v20 }
  0x41   :  { %416 = vmatprep.subr.mxu0 %v554_v0 }
  0x42   :  { %417 = vmatpush3.msra.mxu0 %v265_v21 }
  0x43   :  { %418 = vmatprep.subr.mxu0 %v554_v0 }
  0x44   :  { %419 = vmatpush3.msra.mxu0 %v264_v22 }
  0xfd   :  { %v162_v11 = vpop.f32.mrf.mxu0 }
  0xfe   :  { %v163_v12 = vadd.f32 %v367_v10, %v162_v11 }
  0xff   :  { %v400_v13 = vpop.f32.mrf.mxu0 }
 0x100   :  { %v369_v14 = vmul.f32 -1.442695, %v163_v12 }
 0x102   :  { %432 = vpow2.f32 %v369_v14 }
 0x10f   :  { %v433_v15 = vpop.eup %432 }
 0x110   :  { %v169_v16 = vadd.f32 1.0, %v433_v15 }
 0x112   :  { %434 = vrcp.f32 %v169_v16 }
 0x11f   :  { %v435_v17 = vpop.eup %434 }
 0x120   :  { %v172_v18 = vmul.f32 %v435_v17, %v163_v12 }
 0x122   :  { %410 = vmatmul.mubr.msk.f32.vlgmr.msra.gmra.mxu1 %vm92_vm1, %v172_v18 }
 0x1e2   :  { %v253_v24 = vpop.f32.mrf.mxu1 }
 0x1e3   :  { %v254_v25 = vadd.f32 %v370_v23, %v253_v24 }
 0x1e4   :  { %v411_v26 = vpop.f32.mrf.mxu1 }
 0x1e5   :  { %v372_v27 = vmul.f32 -1.442695, %v254_v25 }
 0x1e7   :  { %436 = vpow2.f32 %v372_v27 }
 0x1f4   :  { %v437_v28 = vpop.eup %436 }
 0x1f5   :  { %v260_v29 = vadd.f32 1.0, %v437_v28 }
 0x1f7   :  { %438 = vrcp.f32 %v260_v29 }
 0x204   :  { %v439_v30 = vpop.eup %438 }
 0x205   :  { %v263_v31 = vmul.f32 %v439_v30, %v254_v25 }
 0x207   :  { %421 = vmatmul.mubr.msk.f32.vlgmr.msra.gmra.mxu0 %vm92_vm1, %v263_v31 }
 0x2c7   :  { %v344_v33 = vpop.f32.mrf.mxu0 }
 0x2c8   :  { %v345_v34 = vadd.f32 %v373_v32, %v344_v33 }
 0x2c9   :  { %v422_v35 = vpop.f32.mrf.mxu0 }
 0x2ca   :  { %349 = vst.msk [vmem:[#allocation10] sm:$0x3] %vm348_vm2, %v345_v34 }
 0x2cb   :  { %531 = shalt.err (!%p528_p10)
}
 0x2cc   :  { %359 = dma.vmem_to_hbm [thread:$0]  %s357_s25, 32, %s643_s7, [#allocation4]  }
 0x2cd   :  { %546 = dma.done.wait [#allocation4], 32  }
 0x2ce   :  { %547 = vsyncadd [#allocation4], 4294967264 }
 0x2cf   :  { %363 = vsyncpa [#allocation3], 1 }
 0x2d0   :  { %364 = vsyncpa [#allocation6], 1 }
 0x2d1   :  { %365 = vsyncpa [#allocation9], 1 }
 0x2d2   :  { %366 = vsyncpa [#allocation4], 1 }

</bundles_post_ra>
